<compile_context>
chip_gen: v7x
topology: tpu7x:2x2x1
jax: 0.10.0
libtpu: 0.0.40
codegen_flags: <defaults>
</compile_context>

<pallas_src>
import functools

import jax
import jax.numpy as jnp
from jax.experimental import pallas as pl
from jax.experimental.pallas import tpu as pltpu

_VMEM_LIMIT = 32 * 1024 * 1024  # safe on v5e/v6e (128 MiB) and v7x (64 MiB)


# ----------------------------------------------------------------------------
# Fused multi-head self-attention + residual + post-LayerNorm (one kernel/batch)
# ----------------------------------------------------------------------------

def _fused_self_att_kernel(x_ref, c_ref, mask_ref, wqkv_ref, wo_ref, g_ref, b_ref,
                           out_ref, prob_ref, *, n_heads, head_dim, eps):
    x = x_ref[...]                                   # (Sq, D)
    c = c_ref[...]                                   # (Skv, D)  = [mem ; x]
    hd = n_heads * head_dim

    wqkv = wqkv_ref[...]                             # (D, 3*H*Dh) fused bank
    # q from the query stream only; k,v from the (mem-concatenated) kv stream.
    q_all = jnp.dot(x, wqkv[:, :hd], preferred_element_type=jnp.float32)     # (Sq, HD)
    kv_all = jnp.dot(c, wqkv[:, hd:], preferred_element_type=jnp.float32)    # (Skv, 2HD)
    k_all = kv_all[:, :hd]
    v_all = kv_all[:, hd:]

    mask = mask_ref[...]                             # (Sq, Skv), 1.0 == disallowed
    neg = jnp.float32(-1e30)
    scale = jnp.float32(1.0 / (head_dim ** 0.5))

    ctx_heads = []
    for h in range(n_heads):                         # static per-head loop (heads stay in VMEM)
        lo, hi = h * head_dim, (h + 1) * head_dim
        qh = q_all[:, lo:hi]
        kh = k_all[:, lo:hi]
        vh = v_all[:, lo:hi]
        s = jnp.dot(qh, kh.T, preferred_element_type=jnp.float32) * scale
        s = jnp.where(mask > 0.0, neg, s)
        m = jnp.max(s, axis=-1, keepdims=True)
        e = jnp.exp(s - m)
        denom = jnp.sum(e, axis=-1, keepdims=True)
        p = e * pl.reciprocal(denom, approx=True)
        prob_ref[h, :, :] = p.astype(prob_ref.dtype)
        ctx_heads.append(jnp.dot(p, vh, preferred_element_type=jnp.float32))
    ctx = jnp.concatenate(ctx_heads, axis=-1)        # (Sq, H*Dh)

    att = jnp.dot(ctx, wo_ref[...], preferred_element_type=jnp.float32)       # (Sq, D)
    y = att + x.astype(jnp.float32)                  # residual (pre_lnorm=False)
    mu = jnp.mean(y, axis=-1, keepdims=True)
    var = jnp.mean((y - mu) ** 2, axis=-1, keepdims=True)
    yn = (y - mu) * jax.lax.rsqrt(var + eps)
    out_ref[...] = (yn * g_ref[...] + b_ref[...]).astype(out_ref.dtype)


def fused_self_attention(att_params, x, mem, mask, eps=1e-5):
    """Returns (out, new_mem, att_prob). mask: (B, Sq, Skv) float, 1.0 = masked."""
    B, Sq, D = x.shape
    H, Dh = att_params["n_heads"], att_params["head_dim"]

    c = x if mem is None else jnp.concatenate([mem, x], axis=1)   # needed for new_mem anyway
    Skv = c.shape[1]
    mask = mask.astype(jnp.float32)

    kernel = functools.partial(_fused_self_att_kernel,
                               n_heads=H, head_dim=Dh, eps=eps)
    out, prob = pl.pallas_call(
        kernel,
        grid=(B,),
        out_shape=(
            jax.ShapeDtypeStruct((B, Sq, D), x.dtype),
            jax.ShapeDtypeStruct((B, H, Sq, Skv), jnp.float32),
        ),
        in_specs=[
            pl.BlockSpec((None, Sq, D), lambda b: (b, 0, 0)),        # x (query stream)
            pl.BlockSpec((None, Skv, D), lambda b: (b, 0, 0)),       # [mem ; x]
            pl.BlockSpec((None, Sq, Skv), lambda b: (b, 0, 0)),      # mask (shared by all heads)
            pl.BlockSpec((D, 3 * H * Dh), lambda b: (0, 0)),         # fused Wqkv
            pl.BlockSpec((H * Dh, D), lambda b: (0, 0)),             # Wo
            pl.BlockSpec((1, D), lambda b: (0, 0)),                  # ln gamma
            pl.BlockSpec((1, D), lambda b: (0, 0)),                  # ln beta
        ],
        out_specs=(
            pl.BlockSpec((None, Sq, D), lambda b: (b, 0, 0)),
            pl.BlockSpec((None, H, Sq, Skv), lambda b: (b, 0, 0, 0)),
        ),
        compiler_params=pltpu.CompilerParams(
            dimension_semantics=("parallel",),
            vmem_limit_bytes=_VMEM_LIMIT,
        ),
    )(x, c, mask, att_params["Wqkv"], att_params["Wo"],
      att_params["ln_g"], att_params["ln_b"])

    new_mem = c
    return out, new_mem, prob


# ----------------------------------------------------------------------------
# Fused ResidualFF: Linear -> ReLU -> Linear -> residual -> post-LayerNorm
# (row-tiled, parallel grid axis)
# ----------------------------------------------------------------------------

def _ffn_kernel(x_ref, w1_ref, b1_ref, w2_ref, b2_ref, g_ref, bln_ref, o_ref, *, eps):
    x = x_ref[...]                                                   # (TM, D)
    h = jnp.dot(x, w1_ref[...], preferred_element_type=jnp.float32) + b1_ref[...]
    h = jnp.maximum(h, 0.0)
    y = jnp.dot(h, w2_ref[...], preferred_element_type=jnp.float32) + b2_ref[...]
    z = y + x.astype(jnp.float32)                                    # residual
    mu = jnp.mean(z, axis=-1, keepdims=True)
    var = jnp.mean((z - mu) ** 2, axis=-1, keepdims=True)
    zn = (z - mu) * jax.lax.rsqrt(var + eps)
    o_ref[...] = (zn * g_ref[...] + bln_ref[...]).astype(o_ref.dtype)


def residual_ff(ff_params, x, eps=1e-5, block_rows=8):
    B, S, D = x.shape
    P = ff_params["W1"].shape[1]
    M = B * S
    tm = block_rows if (M % block_rows == 0) else M                  # row tile (>= 2 grid steps here)
    xf = x.reshape(M, D)
    kernel = functools.partial(_ffn_kernel, eps=eps)
    out = pl.pallas_call(
        kernel,
        grid=(M // tm,),
        out_shape=jax.ShapeDtypeStruct((M, D), x.dtype),
        in_specs=[
            pl.BlockSpec((tm, D), lambda i: (i, 0)),
            pl.BlockSpec((D, P), lambda i: (0, 0)),
            pl.BlockSpec((1, P), lambda i: (0, 0)),
            pl.BlockSpec((P, D), lambda i: (0, 0)),
            pl.BlockSpec((1, D), lambda i: (0, 0)),
            pl.BlockSpec((1, D), lambda i: (0, 0)),
            pl.BlockSpec((1, D), lambda i: (0, 0)),
        ],
        out_specs=pl.BlockSpec((tm, D), lambda i: (i, 0)),
        compiler_params=pltpu.CompilerParams(
            dimension_semantics=("parallel",),
            vmem_limit_bytes=_VMEM_LIMIT,
        ),
    )(xf, ff_params["W1"], ff_params["b1"], ff_params["W2"], ff_params["b2"],
      ff_params["ln_g"], ff_params["ln_b"])
    return out.reshape(B, S, D)


# ----------------------------------------------------------------------------
# EncoderBlock forward
# ----------------------------------------------------------------------------

def encoder_block(params, inp):
    x, mem, mask = inp
    out, new_mem, att_prob = fused_self_attention(params["self_att"], x, mem, mask)
    out = residual_ff(params["feedforward"], out)
    return out, new_mem, att_prob


# ----------------------------------------------------------------------------
# Deterministic parameter construction
# ----------------------------------------------------------------------------

def init_params(key, hidden_dim, projection_dim, n_heads, head_dim):
    D, P, H, Dh = hidden_dim, projection_dim, n_heads, head_dim
    ks = jax.random.split(key, 4)
    s = 0.02
    self_att = {
        "n_heads": H, "head_dim": Dh,
        # fused [Wq | Wk | Wv] bank so one weight load serves the whole projection
        "Wqkv": s * jax.random.normal(ks[0], (D, 3 * H * Dh), jnp.float32),
        "Wo":   s * jax.random.normal(ks[1], (H * Dh, D), jnp.float32),
        "ln_g": jnp.ones((1, D), jnp.float32),
        "ln_b": jnp.zeros((1, D), jnp.float32),
    }
    feedforward = {
        "W1": s * jax.random.normal(ks[2], (D, P), jnp.float32),
        "b1": jnp.zeros((1, P), jnp.float32),
        "W2": s * jax.random.normal(ks[3], (P, D), jnp.float32),
        "b2": jnp.zeros((1, D), jnp.float32),
        "ln_g": jnp.ones((1, D), jnp.float32),
        "ln_b": jnp.zeros((1, D), jnp.float32),
    }
    return {"self_att": self_att, "feedforward": feedforward}


# ----------------------------------------------------------------------------
# Example run
# ----------------------------------------------------------------------------

if __name__ == "__main__":
    hidden_dim, projection_dim = 32, 64
    n_heads, head_dim = 2, 16
    B, seq_len, mem_len = 2, 8, 4

    key = jax.random.PRNGKey(0)
    k_x, k_mem, k_par = jax.random.split(key, 3)

    x = jax.random.normal(k_x, (B, seq_len, hidden_dim), jnp.float32)
    mem = jax.random.normal(k_mem, (B, mem_len, hidden_dim), jnp.float32)

    # causal mask over [mem ; x] keys: 1.0 = disallowed
    kv_pos = jnp.arange(mem_len + seq_len)[None, :]
    q_pos = jnp.arange(seq_len)[:, None] + mem_len
    mask = jnp.broadcast_to((kv_pos > q_pos).astype(jnp.float32),
                            (B, seq_len, mem_len + seq_len))

    params = init_params(k_par, hidden_dim, projection_dim, n_heads, head_dim)

    out, new_mem, att_prob = encoder_block(params, (x, mem, mask))
    jax.block_until_ready((out, new_mem, att_prob))

    assert out.shape == (B, seq_len, hidden_dim)
    assert new_mem.shape == (B, mem_len + seq_len, hidden_dim)
    assert att_prob.shape == (B, n_heads, seq_len, mem_len + seq_len)
    print("KERNEL_OK")
</pallas_src>

<mosaic_0001>
module attributes {stable_mosaic.version = 11 : i64} {
  func.func @_fused_self_att_kernel(%arg0: i32, %arg1: memref<1x8x32xf32, #tpu.memory_space<vmem>>, %arg2: memref<1x12x32xf32, #tpu.memory_space<vmem>>, %arg3: memref<1x8x12xf32, #tpu.memory_space<vmem>>, %arg4: memref<32x96xf32, #tpu.memory_space<vmem>>, %arg5: memref<32x32xf32, #tpu.memory_space<vmem>>, %arg6: memref<1x32xf32, #tpu.memory_space<vmem>>, %arg7: memref<1x32xf32, #tpu.memory_space<vmem>>, %arg8: memref<1x8x32xf32, #tpu.memory_space<vmem>>, %arg9: memref<1x2x8x12xf32, #tpu.memory_space<vmem>>) attributes {dimension_semantics = [#tpu.dimension_semantics<parallel>], iteration_bounds = array<i64: 2>, scalar_prefetch = 0 : i64, scratch_operands = 0 : i64, tpu.core_type = #tpu.core_type<tc>, window_params = [{transform_indices = @transform_0, window_bounds = array<i64: 1, 8, 32>}, {transform_indices = @transform_1, window_bounds = array<i64: 1, 12, 32>}, {transform_indices = @transform_2, window_bounds = array<i64: 1, 8, 12>}, {pipeline_mode = #tpu.pipeline_mode<synchronous>, transform_indices = @transform_3, window_bounds = array<i64: 32, 96>}, {pipeline_mode = #tpu.pipeline_mode<synchronous>, transform_indices = @transform_4, window_bounds = array<i64: 32, 32>}, {pipeline_mode = #tpu.pipeline_mode<synchronous>, transform_indices = @transform_5, window_bounds = array<i64: 1, 32>}, {pipeline_mode = #tpu.pipeline_mode<synchronous>, transform_indices = @transform_6, window_bounds = array<i64: 1, 32>}, {transform_indices = @transform_7, window_bounds = array<i64: 1, 8, 32>}, {transform_indices = @transform_8, window_bounds = array<i64: 1, 2, 8, 12>}]} {
    %c0 = arith.constant 0 : index
    %c0_0 = arith.constant 0 : index
    %c0_1 = arith.constant 0 : index
    %0 = vector.load %arg1[%c0, %c0_0, %c0_1] : memref<1x8x32xf32, #tpu.memory_space<vmem>>, vector<1x8x32xf32>
    %1 = vector.shape_cast %0 : vector<1x8x32xf32> to vector<8x32xf32>
    %c0_2 = arith.constant 0 : index
    %c0_3 = arith.constant 0 : index
    %c0_4 = arith.constant 0 : index
    %2 = vector.load %arg2[%c0_2, %c0_3, %c0_4] : memref<1x12x32xf32, #tpu.memory_space<vmem>>, vector<1x12x32xf32>
    %3 = vector.shape_cast %2 : vector<1x12x32xf32> to vector<12x32xf32>
    %c0_5 = arith.constant 0 : index
    %c0_6 = arith.constant 0 : index
    %4 = vector.load %arg4[%c0_5, %c0_6] : memref<32x96xf32, #tpu.memory_space<vmem>>, vector<32x96xf32>
    %5 = vector.extract_strided_slice %4 {offsets = [0, 0], sizes = [32, 32], strides = [1, 1]} : vector<32x96xf32> to vector<32x32xf32>
    %cst = arith.constant dense<0.000000e+00> : vector<8x32xf32>
    %6 = tpu.matmul %1, %5, %cst {dimension_numbers = #tpu.dot_dimension_numbers<[1], [0], [0], [1], [0, 0, 1, 1], [], []>} : vector<8x32xf32>, vector<32x32xf32>, vector<8x32xf32> -> vector<8x32xf32>
    %7 = vector.extract_strided_slice %4 {offsets = [0, 32], sizes = [32, 64], strides = [1, 1]} : vector<32x96xf32> to vector<32x64xf32>
    %cst_7 = arith.constant dense<0.000000e+00> : vector<12x64xf32>
    %8 = tpu.matmul %3, %7, %cst_7 {dimension_numbers = #tpu.dot_dimension_numbers<[1], [0], [0], [1], [0, 0, 1, 1], [], []>} : vector<12x32xf32>, vector<32x64xf32>, vector<12x64xf32> -> vector<12x64xf32>
    %9 = vector.extract_strided_slice %8 {offsets = [0, 0], sizes = [12, 32], strides = [1, 1]} : vector<12x64xf32> to vector<12x32xf32>
    %10 = vector.extract_strided_slice %8 {offsets = [0, 32], sizes = [12, 32], strides = [1, 1]} : vector<12x64xf32> to vector<12x32xf32>
    %c0_8 = arith.constant 0 : index
    %c0_9 = arith.constant 0 : index
    %c0_10 = arith.constant 0 : index
    %11 = vector.load %arg3[%c0_8, %c0_9, %c0_10] : memref<1x8x12xf32, #tpu.memory_space<vmem>>, vector<1x8x12xf32>
    %12 = vector.shape_cast %11 : vector<1x8x12xf32> to vector<8x12xf32>
    %13 = vector.extract_strided_slice %6 {offsets = [0, 0], sizes = [8, 16], strides = [1, 1]} : vector<8x32xf32> to vector<8x16xf32>
    %14 = vector.extract_strided_slice %9 {offsets = [0, 0], sizes = [12, 16], strides = [1, 1]} : vector<12x32xf32> to vector<12x16xf32>
    %15 = vector.extract_strided_slice %10 {offsets = [0, 0], sizes = [12, 16], strides = [1, 1]} : vector<12x32xf32> to vector<12x16xf32>
    %16 = tpu.transpose %14, [1, 0] : vector<12x16xf32> -> vector<16x12xf32>
    %cst_11 = arith.constant dense<0.000000e+00> : vector<8x12xf32>
    %17 = tpu.matmul %13, %16, %cst_11 {dimension_numbers = #tpu.dot_dimension_numbers<[1], [0], [0], [1], [0, 0, 1, 1], [], []>} : vector<8x16xf32>, vector<16x12xf32>, vector<8x12xf32> -> vector<8x12xf32>
    %cst_12 = arith.constant 2.500000e-01 : f32
    %18 = vector.broadcast %cst_12 : f32 to vector<8x12xf32>
    %19 = arith.mulf %17, %18 : vector<8x12xf32>
    %cst_13 = arith.constant 0.000000e+00 : f32
    %20 = vector.broadcast %cst_13 : f32 to vector<8x12xf32>
    %21 = arith.cmpf ogt, %12, %20 : vector<8x12xf32>
    %cst_14 = arith.constant -1.000000e+30 : f32
    %22 = vector.broadcast %cst_14 : f32 to vector<8x12xf32>
    %23 = arith.select %21, %22, %19 : vector<8x12xi1>, vector<8x12xf32>
    %cst_15 = arith.constant dense<0xFF800000> : vector<8xf32>
    %24 = vector.multi_reduction <maximumf>, %23, %cst_15 [1] : vector<8x12xf32> to vector<8xf32>
    %25 = vector.shape_cast %24 : vector<8xf32> to vector<8x1xf32>
    %26 = vector.broadcast %25 : vector<8x1xf32> to vector<8x12xf32>
    %27 = arith.subf %23, %26 : vector<8x12xf32>
    %28 = math.exp %27 : vector<8x12xf32>
    %cst_16 = arith.constant dense<0.000000e+00> : vector<8xf32>
    %29 = vector.multi_reduction <add>, %28, %cst_16 [1] : vector<8x12xf32> to vector<8xf32>
    %30 = vector.shape_cast %29 : vector<8xf32> to vector<8x1xf32>
    %31 = tpu.reciprocal %30 {approx = true} : vector<8x1xf32> -> vector<8x1xf32>
    %32 = vector.broadcast %31 : vector<8x1xf32> to vector<8x12xf32>
    %33 = arith.mulf %28, %32 : vector<8x12xf32>
    %c0_17 = arith.constant 0 : index
    %c0_18 = arith.constant 0 : index
    %c0_19 = arith.constant 0 : index
    %c0_20 = arith.constant 0 : index
    %34 = vector.load %arg9[%c0_17, %c0_18, %c0_19, %c0_20] : memref<1x2x8x12xf32, #tpu.memory_space<vmem>>, vector<1x1x8x12xf32>
    %35 = vector.shape_cast %34 : vector<1x1x8x12xf32> to vector<8x12xf32>
    %36 = vector.shape_cast %33 : vector<8x12xf32> to vector<1x1x8x12xf32>
    tpu.vector_store %arg9[%c0_17, %c0_18, %c0_19, %c0_20], %36 {strides = array<i32>} : memref<1x2x8x12xf32, #tpu.memory_space<vmem>>, vector<1x1x8x12xf32>,
    %cst_21 = arith.constant dense<0.000000e+00> : vector<8x16xf32>
    %37 = tpu.matmul %33, %15, %cst_21 {dimension_numbers = #tpu.dot_dimension_numbers<[1], [0], [0], [1], [0, 0, 1, 1], [], []>} : vector<8x12xf32>, vector<12x16xf32>, vector<8x16xf32> -> vector<8x16xf32>
    %38 = vector.extract_strided_slice %6 {offsets = [0, 16], sizes = [8, 16], strides = [1, 1]} : vector<8x32xf32> to vector<8x16xf32>
    %39 = vector.extract_strided_slice %9 {offsets = [0, 16], sizes = [12, 16], strides = [1, 1]} : vector<12x32xf32> to vector<12x16xf32>
    %40 = vector.extract_strided_slice %10 {offsets = [0, 16], sizes = [12, 16], strides = [1, 1]} : vector<12x32xf32> to vector<12x16xf32>
    %41 = tpu.transpose %39, [1, 0] : vector<12x16xf32> -> vector<16x12xf32>
    %cst_22 = arith.constant dense<0.000000e+00> : vector<8x12xf32>
    %42 = tpu.matmul %38, %41, %cst_22 {dimension_numbers = #tpu.dot_dimension_numbers<[1], [0], [0], [1], [0, 0, 1, 1], [], []>} : vector<8x16xf32>, vector<16x12xf32>, vector<8x12xf32> -> vector<8x12xf32>
    %cst_23 = arith.constant 2.500000e-01 : f32
    %43 = vector.broadcast %cst_23 : f32 to vector<8x12xf32>
    %44 = arith.mulf %42, %43 : vector<8x12xf32>
    %cst_24 = arith.constant 0.000000e+00 : f32
    %45 = vector.broadcast %cst_24 : f32 to vector<8x12xf32>
    %46 = arith.cmpf ogt, %12, %45 : vector<8x12xf32>
    %cst_25 = arith.constant -1.000000e+30 : f32
    %47 = vector.broadcast %cst_25 : f32 to vector<8x12xf32>
    %48 = arith.select %46, %47, %44 : vector<8x12xi1>, vector<8x12xf32>
    %cst_26 = arith.constant dense<0xFF800000> : vector<8xf32>
    %49 = vector.multi_reduction <maximumf>, %48, %cst_26 [1] : vector<8x12xf32> to vector<8xf32>
    %50 = vector.shape_cast %49 : vector<8xf32> to vector<8x1xf32>
    %51 = vector.broadcast %50 : vector<8x1xf32> to vector<8x12xf32>
    %52 = arith.subf %48, %51 : vector<8x12xf32>
    %53 = math.exp %52 : vector<8x12xf32>
    %cst_27 = arith.constant dense<0.000000e+00> : vector<8xf32>
    %54 = vector.multi_reduction <add>, %53, %cst_27 [1] : vector<8x12xf32> to vector<8xf32>
    %55 = vector.shape_cast %54 : vector<8xf32> to vector<8x1xf32>
    %56 = tpu.reciprocal %55 {approx = true} : vector<8x1xf32> -> vector<8x1xf32>
    %57 = vector.broadcast %56 : vector<8x1xf32> to vector<8x12xf32>
    %58 = arith.mulf %53, %57 : vector<8x12xf32>
    %c0_28 = arith.constant 0 : index
    %c1 = arith.constant 1 : index
    %c0_29 = arith.constant 0 : index
    %c0_30 = arith.constant 0 : index
    %59 = vector.load %arg9[%c0_28, %c1, %c0_29, %c0_30] : memref<1x2x8x12xf32, #tpu.memory_space<vmem>>, vector<1x1x8x12xf32>
    %60 = vector.shape_cast %59 : vector<1x1x8x12xf32> to vector<8x12xf32>
    %61 = vector.shape_cast %58 : vector<8x12xf32> to vector<1x1x8x12xf32>
    tpu.vector_store %arg9[%c0_28, %c1, %c0_29, %c0_30], %61 {strides = array<i32>} : memref<1x2x8x12xf32, #tpu.memory_space<vmem>>, vector<1x1x8x12xf32>,
    %cst_31 = arith.constant dense<0.000000e+00> : vector<8x16xf32>
    %62 = tpu.matmul %58, %40, %cst_31 {dimension_numbers = #tpu.dot_dimension_numbers<[1], [0], [0], [1], [0, 0, 1, 1], [], []>} : vector<8x12xf32>, vector<12x16xf32>, vector<8x16xf32> -> vector<8x16xf32>
    %63 = tpu.concatenate %37, %62 in 1 : vector<8x16xf32>, vector<8x16xf32> -> vector<8x32xf32>
    %c0_32 = arith.constant 0 : index
    %c0_33 = arith.constant 0 : index
    %64 = vector.load %arg5[%c0_32, %c0_33] : memref<32x32xf32, #tpu.memory_space<vmem>>, vector<32x32xf32>
    %cst_34 = arith.constant dense<0.000000e+00> : vector<8x32xf32>
    %65 = tpu.matmul %63, %64, %cst_34 {dimension_numbers = #tpu.dot_dimension_numbers<[1], [0], [0], [1], [0, 0, 1, 1], [], []>} : vector<8x32xf32>, vector<32x32xf32>, vector<8x32xf32> -> vector<8x32xf32>
    %66 = arith.addf %65, %1 : vector<8x32xf32>
    %cst_35 = arith.constant dense<0.000000e+00> : vector<8xf32>
    %67 = vector.multi_reduction <add>, %66, %cst_35 [1] : vector<8x32xf32> to vector<8xf32>
    %68 = vector.shape_cast %67 : vector<8xf32> to vector<8x1xf32>
    %cst_36 = arith.constant 3.200000e+01 : f32
    %69 = vector.broadcast %cst_36 : f32 to vector<8x1xf32>
    %70 = arith.divf %68, %69 : vector<8x1xf32>
    %71 = vector.broadcast %70 : vector<8x1xf32> to vector<8x32xf32>
    %72 = arith.subf %66, %71 : vector<8x32xf32>
    %73 = arith.mulf %72, %72 : vector<8x32xf32>
    %cst_37 = arith.constant dense<0.000000e+00> : vector<8xf32>
    %74 = vector.multi_reduction <add>, %73, %cst_37 [1] : vector<8x32xf32> to vector<8xf32>
    %75 = vector.shape_cast %74 : vector<8xf32> to vector<8x1xf32>
    %cst_38 = arith.constant 3.200000e+01 : f32
    %76 = vector.broadcast %cst_38 : f32 to vector<8x1xf32>
    %77 = arith.divf %75, %76 : vector<8x1xf32>
    %78 = vector.broadcast %70 : vector<8x1xf32> to vector<8x32xf32>
    %79 = arith.subf %66, %78 : vector<8x32xf32>
    %cst_39 = arith.constant 9.99999974E-6 : f32
    %80 = vector.broadcast %cst_39 : f32 to vector<8x1xf32>
    %81 = arith.addf %77, %80 : vector<8x1xf32>
    %82 = math.rsqrt %81 : vector<8x1xf32>
    %83 = vector.broadcast %82 : vector<8x1xf32> to vector<8x32xf32>
    %84 = arith.mulf %79, %83 : vector<8x32xf32>
    %c0_40 = arith.constant 0 : index
    %c0_41 = arith.constant 0 : index
    %85 = vector.load %arg6[%c0_40, %c0_41] : memref<1x32xf32, #tpu.memory_space<vmem>>, vector<1x32xf32>
    %86 = vector.broadcast %85 : vector<1x32xf32> to vector<8x32xf32>
    %87 = arith.mulf %84, %86 : vector<8x32xf32>
    %c0_42 = arith.constant 0 : index
    %c0_43 = arith.constant 0 : index
    %88 = vector.load %arg7[%c0_42, %c0_43] : memref<1x32xf32, #tpu.memory_space<vmem>>, vector<1x32xf32>
    %89 = vector.broadcast %88 : vector<1x32xf32> to vector<8x32xf32>
    %90 = arith.addf %87, %89 : vector<8x32xf32>
    %c0_44 = arith.constant 0 : index
    %c0_45 = arith.constant 0 : index
    %c0_46 = arith.constant 0 : index
    %91 = vector.load %arg8[%c0_44, %c0_45, %c0_46] : memref<1x8x32xf32, #tpu.memory_space<vmem>>, vector<1x8x32xf32>
    %92 = vector.shape_cast %91 : vector<1x8x32xf32> to vector<8x32xf32>
    %93 = vector.shape_cast %90 : vector<8x32xf32> to vector<1x8x32xf32>
    tpu.vector_store %arg8[%c0_44, %c0_45, %c0_46], %93 {strides = array<i32>} : memref<1x8x32xf32, #tpu.memory_space<vmem>>, vector<1x8x32xf32>,
    return
  }
  func.func @transform_0(%arg0: i32) -> (i32, i32, i32) {
    %c0_i32 = arith.constant 0 : i32
    %c0_i32_0 = arith.constant 0 : i32
    %c0_i32_1 = arith.constant 0 : i32
    return %arg0, %c0_i32, %c0_i32_0 : i32, i32, i32
  }
  func.func @transform_1(%arg0: i32) -> (i32, i32, i32) {
    %c0_i32 = arith.constant 0 : i32
    %c0_i32_0 = arith.constant 0 : i32
    %c0_i32_1 = arith.constant 0 : i32
    return %arg0, %c0_i32, %c0_i32_0 : i32, i32, i32
  }
  func.func @transform_2(%arg0: i32) -> (i32, i32, i32) {
    %c0_i32 = arith.constant 0 : i32
    %c0_i32_0 = arith.constant 0 : i32
    %c0_i32_1 = arith.constant 0 : i32
    return %arg0, %c0_i32, %c0_i32_0 : i32, i32, i32
  }
  func.func @transform_3(%arg0: i32) -> (i32, i32) {
    %c0_i32 = arith.constant 0 : i32
    %c0_i32_0 = arith.constant 0 : i32
    %c0_i32_1 = arith.constant 0 : i32
    return %c0_i32, %c0_i32_0 : i32, i32
  }
  func.func @transform_4(%arg0: i32) -> (i32, i32) {
    %c0_i32 = arith.constant 0 : i32
    %c0_i32_0 = arith.constant 0 : i32
    %c0_i32_1 = arith.constant 0 : i32
    return %c0_i32, %c0_i32_0 : i32, i32
  }
  func.func @transform_5(%arg0: i32) -> (i32, i32) {
    %c0_i32 = arith.constant 0 : i32
    %c0_i32_0 = arith.constant 0 : i32
    %c0_i32_1 = arith.constant 0 : i32
    return %c0_i32, %c0_i32_0 : i32, i32
  }
  func.func @transform_6(%arg0: i32) -> (i32, i32) {
    %c0_i32 = arith.constant 0 : i32
    %c0_i32_0 = arith.constant 0 : i32
    %c0_i32_1 = arith.constant 0 : i32
    return %c0_i32, %c0_i32_0 : i32, i32
  }
  func.func @transform_7(%arg0: i32) -> (i32, i32, i32) {
    %c0_i32 = arith.constant 0 : i32
    %c0_i32_0 = arith.constant 0 : i32
    %c0_i32_1 = arith.constant 0 : i32
    return %arg0, %c0_i32, %c0_i32_0 : i32, i32, i32
  }
  func.func @transform_8(%arg0: i32) -> (i32, i32, i32, i32) {
    %c0_i32 = arith.constant 0 : i32
    %c0_i32_0 = arith.constant 0 : i32
    %c0_i32_1 = arith.constant 0 : i32
    %c0_i32_2 = arith.constant 0 : i32
    return %arg0, %c0_i32, %c0_i32_0, %c0_i32_1 : i32, i32, i32, i32
  }
}

</mosaic_0001>

<bundles_post_ra>
// kernel: tpu_custom_call.1
= control target key start
LH: loop header
LB: loop body
LE: loop exit
PB: predicated region body
PF: predicated region fallthrough
CT: control target
= control target key end

     0   :  { %s2056_s0 = inlined_call_operand.hbm [shape: f32[2,8,32], index: 0, kind: input, shape index: {}]   ;;  %s2057_s1 = inlined_call_operand.vmem [shape: f32[2,12,32], index: 1, kind: input, shape index: {}]   ;;  %s2058_s2 = inlined_call_operand.hbm [shape: f32[2,8,12], index: 2, kind: input, shape index: {}]   ;;  %s2059_s3 = inlined_call_operand.vmem [shape: f32[32,96], index: 3, kind: input, shape index: {}]   ;;  %s2060_s4 = inlined_call_operand.vmem [shape: f32[32,32], index: 4, kind: input, shape index: {}]   ;;  %s2061_s5 = inlined_call_operand.vmem [shape: f32[1,32], index: 5, kind: input, shape index: {}]   ;;  %s2062_s6 = inlined_call_operand.vmem [shape: f32[1,32], index: 6, kind: input, shape index: {}]   ;;  %s2063_s7 = inlined_call_operand.hbm [shape: f32[2,8,32], index: 7, kind: output, shape index: {0}]   ;;  %s2064_s8 = inlined_call_operand.hbm [shape: f32[2,2,8,12], index: 8, kind: output, shape index: {1}]  }
   0x1   :  { %2069 = sst [smem:[#allocation15_spill]] %s2056_s0 }
   0x2   :  { %14 = vsyncpa [#allocation3], 0 }
   0x3   :  { %16 = vsyncpa [#allocation3 + $0x1], 0 }
   0x4   :  { %17 = vsyncpa [#allocation6], 0 }
   0x5   :  { %19 = vsyncpa [#allocation6 + $0x1], 0 }
   0x6   :  { %20 = vsyncpa [#allocation4], 0 }
   0x7   :  { %22 = vsyncpa [#allocation4 + $0x1], 0 }
   0x8   :  { %23 = vsyncpa [#allocation9], 0 }
   0x9   :  { %25 = vsyncpa [#allocation9 + $0x1], 0  ;;  %s1696_s27 = smov 0   ;;  %s1698_s28 = smov 0  }
   0xa   :  { %s1700_s29 = smov 0   ;;  %s1702_s30 = smov 0  }
   0xb LB: > { %s1717_s9 = sadd.s32 4294967295, %s1635_s30   ;;  %s1207_s10 = sadd.s32 4294967294, %s1635_s30   ;;  %s1635_s30 = sphi %s1702_s30, %s2096_s30   ;;  %s1631_s29 = sphi %s1700_s29, %s2095_s29   ;;  %s1627_s28 = sphi %s1698_s28, %s2094_s28   ;;  %s1623_s27 = sphi %s1696_s27, %s2093_s27  }
   0xc   : > { %s1721_s11 = sadd.s32 1, %s1635_s30   ;;  %s38_s12 = sadd.s32 1, %s1631_s29 }
   0xd   : > { %s35_s13 = ssub.s32 %s1635_s30, %s1721_s11  ;;  %p45_p0 = scmp.ne.s32.totalorder %s1631_s29, %s1627_s28 }
   0xe   : > { %p36_p1 = scmp.eq.s32.totalorder %s35_s13, 0  ;;  %p46_p2 = scmp.eq.s32.totalorder %s1635_s30, 0 }
   0xf   : > { %p51_p3 = scmp.ne.s32.totalorder %s1627_s28, %s1623_s27  ;;  %p52_p4 = scmp.eq.s32.totalorder %s1717_s9, 0 }
  0x10   : > { %s1733_s14 = scalar_select %p36_p1, %s1631_s29, %s38_s12  }
  0x11   : > { %p1735_p5 = por %p46_p2, %p45_p0  ;;  %p1739_p6 = por %p52_p4, %p51_p3 }
  0x12   : > { %2070 = sst [smem:[#allocation14_spill]] %s1733_s14  ;;  %p211_p7 = scmp.eq.s32.totalorder %s1717_s9, 1 }
  0x13   : > { %s2072_s16 = scalar_select %p1739_p6, 1, 0 }
  0x14   : > { %p217_p8 = scmp.eq.s32.totalorder %s1207_s10, 1  ;;  %p1394_p10 = scmp.lt.s32.totalorder %s1635_s30, 2 }
  0x15   : > { %p1746_p11 = por %p211_p7, %p45_p0  ;;  %s1755_s19 = sand.u32 1, %s1631_s29  }
  0x16   : > { %p1750_p12 = por %p217_p8, %p51_p3  ;;  %s2066_s20 = sshll.u32 %s1635_s30, 7 }
  0x17   : > { %s2073_s17 = scalar_select %p1746_p11, 1, 0 }
  0x18   : > { %s2074_s18 = scalar_select %p1750_p12, 1, 0 }
  0x19   : > { %s2065_s21 = sshll.u32 %s1755_s19, 3  ;;  %s2075_s0 = sld [smem:[#allocation15_spill]] }
  0x1a   : > { %s279_s25 = scalar_lea.vmem [#allocation2], %s2065_s21  ;;  %p1770_p13 = pnand %p1394_p10, %p1735_p5 }
  0x1b   : > { %s286_s26 = sshll.u32 %s279_s25, 4  ;;  %s276_s12 = scalar_lea.sflag [#allocation3], %s1755_s19  ;;  %s1774_s26 = int_to_ptr.vmem [resolvable:$true] %s286_s26 }
  0x1c   : > { %p1475_p3 = pneg %p1770_p13 }
  0x1f   : > { %s1764_s24 = scalar_lea.hbm %s2075_s0, %s2066_s20  ;;  %s1478_s23 = scalar_lea.hbm %s2075_s0, 256 }
  0x20   : > { %s1473_s13 = scalar_lea.hbm %s1764_s24, 128  ;;  %p1479_p5 = scmp.lt.u32.totalorder %s1764_s24, %s2075_s0 }
  0x21   : > { %p1474_p2 = scmp.ne.s32.totalorder %s1764_s24, %s1473_s13  ;;  %p1480_p8 = scmp.lt.u32.totalorder %s1478_s23, %s1473_s13 }
  0x22   : > { %p1482_p9 = scmp.lt.u32.totalorder %s1473_s13, %s1764_s24 }
  0x23   : > { %p1476_p4 = pnand %p1475_p3, %p1474_p2  ;;  %p1481_p10 = por %p1480_p8, %p1479_p5 }
  0x25   : > { %p1477_p7 = pneg %p1476_p4  ;;  %p1483_p0 = por %p1482_p9, %p1481_p10 }
  0x27   : > { %p1484_p1 = pnand %p1483_p0, %p1477_p7 }
  0x29   : > { %1487 = shalt.err (!%p1484_p1)
}
  0x2a   : > { %s1488_s20 = scalar_lea.vmem %s1774_s26, 128  ;;  %s1637_s15 = smov [#allocation2]  }
  0x2b   : > { %p1489_p2 = scmp.ne.s32.totalorder %s1774_s26, %s1488_s20  ;;  %s1493_s22 = sshll.u32 %s1637_s15, 4  ;;  %s1494_s22 = int_to_ptr.vmem [resolvable:$false] %s1493_s22 }
  0x2c   : > { %s1495_s21 = scalar_lea.vmem %s1494_s22, 256  ;;  %p1496_p11 = scmp.lt.s32.totalorder %s1774_s26, %s1494_s22 }
  0x2d   : > { %p1491_p4 = pnand %p1489_p2, %p1475_p3  ;;  %p1497_p5 = scmp.lt.s32.totalorder %s1495_s21, %s1488_s20 }
  0x2f   : > { %p1492_p12 = pneg %p1491_p4  ;;  %p1498_p8 = por %p1497_p5, %p1496_p11 }
  0x31   : > { %p1499_p9 = pnand %p1498_p8, %p1492_p12 }
  0x33   : > { %1502 = shalt.err (!%p1499_p9)
}
  0x34   : > { %1383 = dma.hbm_to_vmem [thread:$0]  (!%p1770_p13), %s1764_s24, 128, %s1774_s26, %s276_s12  }
  0x35   : > { %p2077_p0 = scmp.lt.s32.totalorder %s1635_s30, 3  ;;  %p2078_p1 = scmp.ge.s32.totalorder %s1635_s30, 1 }
  0x36   : > { %s2080_s20 = sshll.u32 %s1635_s30, 7  ;;  %s2081_s22 = sshll.u32 %s1755_s19, 3 }
  0x37   : > { %p1808_p7 = pnand %p2078_p1, %p2077_p0  ;;  %s1817_s15 = scalar_lea.hbm %s2058_s2, %s2080_s20 }
  0x38   : > { %s305_s21 = scalar_lea.vmem [#allocation5], %s2081_s22  ;;  %s302_s24 = scalar_lea.sflag [#allocation6], %s1755_s19 }
  0x39   : > { %s2079_s13 = scalar_select %p1808_p7, 1, 0 }
  0x3a   : > { %s312_s0 = sshll.u32 %s305_s21, 4  ;;  %s1503_s26 = scalar_lea.hbm %s1817_s15, 128  ;;  %s313_s0 = int_to_ptr.vmem [resolvable:$true] %s312_s0 }
  0x3b   : > { %p1504_p11 = scmp.ne.s32.totalorder %s1817_s15, %s1503_s26  ;;  %s1508_s20 = scalar_lea.hbm %s2058_s2, 256 }
  0x3c   : > { %p1509_p2 = scmp.lt.u32.totalorder %s1817_s15, %s2058_s2  ;;  %p1510_p4 = scmp.lt.u32.totalorder %s1508_s20, %s1503_s26 }
  0x3d   : > { %p1506_p12 = pnand %p1504_p11, %p1475_p3  ;;  %p1512_p8 = scmp.lt.u32.totalorder %s1503_s26, %s1817_s15 }
  0x3e   : > { %p1511_p5 = por %p1510_p4, %p1509_p2 }
  0x3f   : > { %p1507_p10 = pneg %p1506_p12 }
  0x40   : > { %p1513_p9 = por %p1512_p8, %p1511_p5 }
  0x42   : > { %p1514_p0 = pnand %p1513_p9, %p1507_p10 }
  0x44   : > { %1517 = shalt.err (!%p1514_p0)
}
  0x45   : > { %s1518_s19 = scalar_lea.vmem %s313_s0, 128  ;;  %s1638_s22 = smov [#allocation5]  }
  0x46   : > { %p1519_p1 = scmp.ne.s32.totalorder %s313_s0, %s1518_s19  ;;  %s1523_s14 = sshll.u32 %s1638_s22, 4  ;;  %s1524_s14 = int_to_ptr.vmem [resolvable:$false] %s1523_s14 }
  0x47   : > { %s1525_s21 = scalar_lea.vmem %s1524_s14, 256  ;;  %p1526_p6 = scmp.lt.s32.totalorder %s313_s0, %s1524_s14 }
  0x48   : > { %p1521_p11 = pnand %p1519_p1, %p1475_p3  ;;  %p1527_p7 = scmp.lt.s32.totalorder %s1525_s21, %s1518_s19 }
  0x4a   : > { %p1522_p12 = pneg %p1521_p11  ;;  %p1528_p2 = por %p1527_p7, %p1526_p6 }
  0x4c   : > { %p1529_p4 = pnand %p1528_p2, %p1522_p12 }
  0x4e   : > { %1532 = shalt.err (!%p1529_p4)
}
  0x4f   : > { %1386 = dma.hbm_to_vmem [thread:$0]  (!%p1770_p13), %s1817_s15, 128, %s313_s0, %s302_s24  }
  0x50   : > { %p2082_p10 = scmp.ne.s32.totalorder %s2079_s13, 0 }
  0x51   : > { %s1844_s26 = sand.u32 (!%p2082_p10), 1, %s1627_s28   ;;  %p2083_p6 = scmp.ne.s32.totalorder (!%p2082_p10), %s2072_s16, 0 }
  0x52   : > { %321 = sbr.rel (%p2082_p10) target bundleno = 2382 (0x94e), region = 48  ;;  %s1847_s12 = sshll.u32 (!%p2082_p10), %s1844_s26, 3 }
  0x53   : > { %s324_s20 = scalar_lea.sflag (!%p2082_p10), [#allocation3], %s1844_s26  ;;  %s327_s23 = scalar_lea.vmem (!%p2082_p10), [#allocation2], %s1847_s12 }
  0x59   : > { %1606 = dma.done.wait (%p2083_p6), %s324_s20, 128  }
  0x5a   : > { %1608 = vsyncadd (%p2083_p6), %s324_s20, 4294967168  ;;  %s333_s0 = scalar_lea.sflag [#allocation6], %s1844_s26 }
  0x5b   : > { %1610 = dma.done.wait (%p2083_p6), %s333_s0, 128  }
  0x5c   : > { %1612 = vsyncadd (%p2083_p6), %s333_s0, 4294967168  ;;  %p384_p13 = scmp.lt.s32.totalorder %s1717_s9, 1  ;;  %vm396_vm0 = vcmask 261120   ;;  %v392_v0 = vld [vmem:[%s2059_s3] sm:$0xff]  ;;  %v393_v1 = vld [vmem:[%s2059_s3 + $0x8] sm:$0xff]  ;;  %v1640_v8 = vmov 0.0|0.0  }
  0x5d   : > { %v394_v2 = vld [vmem:[%s2059_s3 + $0x10] sm:$0xff]  ;;  %v1438_v3 = vpack.i.bf16 %v393_v1, %v392_v0  ;;  %v395_v4 = vld [vmem:[%s2059_s3 + $0x18] sm:$0xff]  ;;  %v1337_v6 = vpack.c.bf16 %v393_v1, %v392_v0  ;;  %1336 = vmatprep.subr.bf16.mxu0 %v1640_v8  ;;  %vm1641_vm1 = vmmov 0   ;;  %v1642_v10 = vmov 0.0   ;;  %v1890_v11 = vld [vmem:[%s327_s23] sm:$0xff]  ;;  %s1643_s23 = smov 112  }
  0x5e   : > { %s385_s13 = scalar_select %p384_p13, %s1717_s9, 1  ;;  %v1443_v7 = vpack.i.bf16 %v395_v4, %v394_v2  ;;  %v1340_v9 = vpack.c.bf16 %v395_v4, %v394_v2  ;;  %1283 = vmatprep.mubr.msk.f32.mxu0 %vm1641_vm1, %v1642_v10  ;;  %vm568_vm2 = vcmask 130048   ;;  %vm672_vm4 = vcmask 1043456  }
  0x5f   : > { %1338 = vmatpush3.bf16.msra.mxu0 %v1337_v6  ;;  %vm1904_vm3 = vmpackc.low %vm568_vm2, %vm568_vm2  ;;  %vm1644_vm5 = vmmov 1   ;;  %s2088_s10 = scalar_lea.vmem [#allocation5], %s1847_s12  ;;  %vm651_vm8 = vcmask 97280   ;;  %s1218_s24 = sshll.u32 %s1844_s26, 4 }
  0x60   : > { %s1245_s15 = sshll.u32 %s385_s13, 4  ;;  %1339 = vmatprep.subr.bf16.mxu0 %v1640_v8  ;;  %vm1915_vm6 = vmpackc.low %vm672_vm4, %vm1644_vm5  ;;  %v567_v33 = vld [vmem:[%s2088_s10] sm:$0xff]  ;;  %s1929_s25 = scalar_lea.vmem [#allocation8], %s1218_s24 }
  0x61   : > { %s1866_s19 = scalar_lea.vmem %s2057_s1, %s1245_s15  ;;  %s1639_s15 = smov 96   ;;  %vm649_vm7 = vcmp.gt.f32.partialorder %v567_v33, 0.0 }
  0x62   : > { %v390_v5 = vld [vmem:[%s1866_s19] sm:$0xff]  ;;  %1439 = vrot.lane.b32.xlu0 %v1438_v3, %s1639_s15  ;;  %v391_v20 = vld [vmem:[%s1866_s19 + $0x8] sm:$0xf]  ;;  %s1645_s19 = smov 80   ;;  %s1246_s10 = sshll.u32 %s1717_s9, 8 }
  0x63   : > { %1294 = vmatprep.mubr.msk.f32.mxu1 %vm396_vm0, %v390_v5  ;;  %1341 = vmatpush3.bf16.msra.mxu0 %v1340_v9  ;;  %v928_v9 = vld [vmem:[%s2060_s4 + $0x8] sm:$0xff]  ;;  %s1067_s24 = sshll.u32 %s1929_s25, 4  ;;  %s1972_s14 = scalar_lea.hbm %s2064_s8, %s1246_s10  ;;  %s1974_s24 = int_to_ptr.vmem [resolvable:$true] %s1067_s24 }
  0x64   : > { %1350 = vmatprep.subr.bf16.mxu0 %v1640_v8  ;;  %s1041_s21 = scalar_lea.sflag [#allocation9], %s1844_s26  ;;  %s1533_s20 = scalar_lea.vmem %s1974_s24, 256 }
  0x65   : > { %p1534_p3 = scmp.ne.s32.totalorder %s1974_s24, %s1533_s20  ;;  %p2089_p7 = scmp.ne.s32.totalorder %s2073_s17, 0 }
  0x66   : > { %1444 = vrot.lane.b32.xlu0 %v1443_v7, %s1639_s15  ;;  %1284 = vmatmul.mubr.msk.f32.vlgmr.msra.gmra.mrb[0].mxu0 %vm396_vm0, %v1890_v11  ;;  %v927_v7 = vld [vmem:[%s2060_s4] sm:$0xff]  ;;  %s1647_s16 = smov [#allocation8]  }
  0x67   : > { %1301 = vmatprep.mubr.msk.f32.mxu0 %vm1641_vm1, %v1642_v10  ;;  %p1535_p5 = pnand %p1534_p3, %p2089_p7  ;;  %s1537_s0 = sshll.u32 %s1647_s16, 4  ;;  %s1538_s0 = int_to_ptr.vmem [resolvable:$false] %s1537_s0 }
  0x68   : > { %p1540_p9 = scmp.lt.s32.totalorder %s1974_s24, %s1538_s0 }
  0x69   : > { %p1536_p8 = pneg %p1535_p5 }
  0xd4   : > { %v1440_v12 = vpop.permute.xlu0 %1439 }
  0xd5   : > { %v1442_v13 = vunpack.i.h.bf16 %v1440_v12  ;;  %v1441_v14 = vunpack.i.l.bf16 %v1440_v12  ;;  %v1367_v12 = vpack.c.bf16 %v928_v9, %v927_v7 }
  0xd7   : > { %v1342_v15 = vpack.c.bf16 %v1442_v13, %v1441_v14  ;;  %v930_v13 = vld [vmem:[%s2060_s4 + $0x18] sm:$0xff] }
  0xd8   : > { %v1445_v16 = vpop.permute.xlu0 %1444 }
  0xd9   : > { %v1447_v17 = vunpack.i.h.bf16 %v1445_v16  ;;  %v1446_v18 = vunpack.i.l.bf16 %v1445_v16  ;;  %1343 = vmatprep.subr.bf16.mxu1 %v1342_v15 }
  0xda   : > { %1345 = vmatpush3.bf16.msra.mxu1 %v1342_v15 }
  0xdb   : > { %v1346_v19 = vpack.c.bf16 %v1447_v17, %v1446_v18 }
  0xdd   : > { %1347 = vmatprep.subr.bf16.mxu1 %v1346_v19 }
  0xde   : > { %1349 = vmatpush3.bf16.msra.mxu1 %v1346_v19 }
  0xdf   : > { %1354 = vmatprep.subr.bf16.mxu1 %v1640_v8 }
  0xe1   : > { %1295 = vmatmul.mubr.msk.f32.vlgmr.msra.gmra.mrb[0].mxu1 %vm396_vm0, %v391_v20 }
  0xe2   : > { %1308 = vmatprep.mubr.msk.f32.mxu1 %vm1641_vm1, %v1642_v10 }
 0x139   : > { %v466_v21 = vpop.f32.mrb[0].mxu0 }
 0x13a   : > { %v1285_v22 = vpop.f32.mrb[1].mxu0 }
 0x1b4   : > { %v1296_v23 = vpop.f32.mrb[0].mxu1 }
 0x1b5   : > { %v558_v24 = vpop.f32.mrb[1].mxu1 }
 0x1b6   : > { %v1351_v26 = vpack.c.bf16 %v1296_v23, %v558_v24  ;;  %v1448_v27 = vpack.i.bf16 %v1296_v23, %v558_v24 }
 0x1b8   : > { %1449 = vrot.lane.b32.xlu0 %v1448_v27, %s1639_s15  ;;  %1353 = vmatpush3.bf16.xpose.msk.msra.mxu0 %vm1904_vm3, %v1351_v26 }
 0x1b9   : > { %1366 = vmatprep.subr.bf16.mxu0 %v1640_v8 }
 0x1bc   : > { %745 = vrot.lane.b32.xlu0 %v466_v21, %s1643_s23 }
 0x1bf   : > { %1302 = vmatmul.mubr.msk.f32.vlgmr.msra.gmra.mrb[2].mxu0 %vm568_vm2, %v466_v21 }
 0x1c0   : > { %1333 = vmatprep.mubr.msk.f32.mxu0 %vm1641_vm1, %v1642_v10  ;;  %1368 = vmatpush3.bf16.msra.mxu0 %v1367_v12 }
 0x1c1   : > { %1369 = vmatprep.subr.bf16.mxu0 %v1640_v8 }
 0x22a   : > { %v1450_v28 = vpop.permute.xlu0 %1449 }
 0x22b   : > { %v1452_v29 = vunpack.i.h.bf16 %v1450_v28  ;;  %v1451_v30 = vunpack.i.l.bf16 %v1450_v28 }
 0x22d   : > { %v1355_v32 = vpack.c.bf16 %v1452_v29, %v1451_v30 }
 0x22e   : > { %v746_v51 = vpop.permute.xlu0 %745 }
 0x22f   : > { %1357 = vmatpush3.bf16.msk.msra.mxu1 %vm1915_vm6, %v1355_v32 }
 0x230   : > { %1358 = vmatprep.subr.bf16.mxu1 %v1640_v8 }
 0x292   : > { %v644_v34 = vpop.f32.mrb[2].mxu0 }
 0x293   : > { %v648_v35 = vmul.f32 0.25, %v644_v34  ;;  %v1303_v36 = vpop.f32.mrb[3].mxu0 }
 0x295   : > { %v650_v37 = vsel %vm649_vm7, -1e+30, %v648_v35 }
 0x296   : > { %v652_v38 = vsel %vm651_vm8, %v650_v37, -inf }
 0x297   : > { %653 = vmax.xlane.f32.xlu1 %v652_v38 }
 0x324   : > { %v654_v39 = vpop.xlane.xlu1 %653 }
 0x325   : > { %v655_v40 = vsub.f32 %v650_v37, %v654_v39 }
 0x327   : > { %v656_v41 = vmul.f32 1.442695, %v655_v40 }
 0x329   : > { %1463 = vpow2.f32 %v656_v41 }
 0x333   : > { %v1464_v42 = vpop.eup %1463 }
 0x334   : > { %v658_v43 = vsel %vm651_vm8, %v1464_v42, 0.0 }
 0x335   : > { %659 = vadd.xlane.f32.xlu1 %v658_v43 }
 0x346   : > { %1454 = vrot.lane.b32.xlu1 %v1448_v27, %s1643_s23  ;;  %s1646_s23 = smov 16  }
 0x3c2   : > { %v660_v44 = vpop.xlane.xlu1 %659 }
 0x3c3   : > { %1465 = vrcp.f32 %v660_v44 }
 0x3c6   : > { %v1455_v45 = vpop.permute.xlu1 %1454 }
 0x3c7   : > { %v1457_v46 = vunpack.i.h.bf16 %v1455_v45  ;;  %v1456_v47 = vunpack.i.l.bf16 %v1455_v45 }
 0x3c9   : > { %v1359_v50 = vpack.c.bf16 %v1457_v46, %v1456_v47 }
 0x3cd   : > { %v1466_v48 = vpop.eup %1465 }
 0x3ce   : > { %v662_v49 = vmul.f32 %v1466_v48, %v1464_v42 }
 0x3d0   : > { %1309 = vmatmul.mubr.msk.f32.vlgmr.msra.gmra.mrb[2].mxu1 %vm651_vm8, %v662_v49  ;;  %663 = vst.msk [vmem:[%s1929_s25] sm:$0xff] %vm651_vm8, %v662_v49 }
 0x3d1   : > { %1361 = vmatpush3.bf16.xpose.msk.msra.mxu1 %vm1904_vm3, %v1359_v50  ;;  %1315 = vmatprep.mubr.msk.f32.mxu1 %vm1641_vm1, %v1642_v10 }
 0x3d2   : > { %1362 = vmatprep.subr.bf16.mxu1 %v1640_v8 }
 0x3d8   : > { %1316 = vmatmul.mubr.msk.f32.vlgmr.msra.gmra.mrb[4].mxu1 %vm568_vm2, %v746_v51 }
 0x3d9   : > { %1322 = vmatprep.mubr.msk.f32.mxu1 %vm1641_vm1, %v1642_v10  ;;  %v929_v10 = vld [vmem:[%s2060_s4 + $0x10] sm:$0xff] }
 0x3da   : > { %v1370_v14 = vpack.c.bf16 %v930_v13, %v929_v10 }
 0x3dc   : > { %1371 = vmatpush3.bf16.msra.mxu0 %v1370_v14 }
 0x4a3   : > { %v741_v52 = vpop.f32.mrb[2].mxu1 }
 0x4a4   : > { %v1310_v53 = vpop.f32.mrb[3].mxu1 }
 0x4ab   : > { %v823_v54 = vpop.f32.mrb[4].mxu1 }
 0x4ac   : > { %v827_v55 = vmul.f32 0.25, %v823_v54  ;;  %v1317_v56 = vpop.f32.mrb[5].mxu1 }
 0x4ae   : > { %v828_v57 = vsel %vm649_vm7, -1e+30, %v827_v55 }
 0x4af   : > { %v829_v58 = vsel %vm651_vm8, %v828_v57, -inf }
 0x4b0   : > { %830 = vmax.xlane.f32.xlu0 %v829_v58 }
 0x4c6   : > { %1459 = vrot.lane.b32.xlu0 %v1448_v27, %s1645_s19 }
 0x53d   : > { %v831_v59 = vpop.xlane.xlu0 %830 }
 0x53e   : > { %v832_v60 = vsub.f32 %v828_v57, %v831_v59 }
 0x540   : > { %v833_v61 = vmul.f32 1.442695, %v832_v60 }
 0x541   : > { %v1460_v62 = vpop.permute.xlu0 %1459 }
 0x542   : > { %1467 = vpow2.f32 %v833_v61  ;;  %v1462_v63 = vunpack.i.h.bf16 %v1460_v62  ;;  %v1461_v0 = vunpack.i.l.bf16 %v1460_v62 }
 0x544   : > { %v1363_v1 = vpack.c.bf16 %v1462_v63, %v1461_v0 }
 0x546   : > { %1365 = vmatpush3.bf16.msk.msra.mxu1 %vm1915_vm6, %v1363_v1 }
 0x54c   : > { %v1468_v2 = vpop.eup %1467 }
 0x54d   : > { %v835_v3 = vsel %vm651_vm8, %v1468_v2, 0.0 }
 0x54e   : > { %836 = vadd.xlane.f32.xlu1 %v835_v3 }
 0x5db   : > { %v837_v4 = vpop.xlane.xlu1 %836 }
 0x5dc   : > { %1469 = vrcp.f32 %v837_v4 }
 0x5e6   : > { %v1470_v5 = vpop.eup %1469 }
 0x5e7   : > { %v839_v6 = vmul.f32 %v1470_v5, %v1468_v2 }
 0x5e9   : > { %1323 = vmatmul.mubr.msk.f32.vlgmr.msra.gmra.mrb[6].mxu1 %vm651_vm8, %v839_v6  ;;  %1232 = vst.msk [vmem:[%s1929_s25 + $0x8] sm:$0xff] %vm651_vm8, %v839_v6  ;;  %s1539_s25 = scalar_lea.vmem %s1538_s0, 512 }
 0x5ea   : > { %p1541_p0 = scmp.lt.s32.totalorder %s1539_s25, %s1533_s20 }
 0x5ec   : > { %p1542_p1 = por %p1541_p0, %p1540_p9 }
 0x5ee   : > { %p1543_p11 = pnand %p1542_p1, %p1536_p8 }
 0x6bc   : > { %v918_v15 = vpop.f32.mrb[6].mxu1 }
 0x6bd   : > { %923 = vrot.lane.b32.xlu1 %v918_v15, %s1646_s23  ;;  %v1324_v16 = vpop.f32.mrb[7].mxu1 }
 0x72f   : > { %v924_v17 = vpop.permute.xlu1 %923 }
 0x730   : > { %v926_v18 = vsel %vm568_vm2, %v741_v52, %v924_v17 }
 0x731   : > { %1334 = vmatmul.mubr.msk.f32.vlgmr.msra.gmra.mrb[4].mxu0 %vm396_vm0, %v926_v18 }
 0x804   : > { %v1000_v19 = vpop.f32.mrb[4].mxu0 }
 0x805   : > { %v1001_v20 = vadd.f32 %v1000_v19, %v1890_v11  ;;  %v1335_v21 = vpop.f32.mrb[5].mxu0 }
 0x807   : > { %v1004_v8 = vsel %vm396_vm0, %v1001_v20, 0.0 }
 0x808   : > { %1005 = vadd.xlane.f32.xlu0 %v1004_v8 }
 0x895   : > { %v1006_v22 = vpop.xlane.xlu0 %1005 }
 0x896   : > { %v1008_v23 = vmul.f32 0.03125, %v1006_v22 }
 0x898   : > { %v1009_v24 = vsub.f32 %v1001_v20, %v1008_v23 }
 0x89a   : > { %v1010_v25 = vmul.f32 %v1009_v24, %v1009_v24 }
 0x89c   : > { %v1011_v26 = vsel %vm396_vm0, %v1010_v25, 0.0 }
 0x89d   : > { %1012 = vadd.xlane.f32.xlu1 %v1011_v26 }
 0x89e   : > { %1546 = shalt.err (!%p1543_p11)
}
 0x89f   : > { %s1547_s13 = scalar_lea.hbm %s1972_s14, 256  ;;  %s1551_s10 = scalar_lea.hbm %s2064_s8, 512 }
 0x8a0   : > { %p1548_p12 = scmp.ne.s32.totalorder %s1972_s14, %s1547_s13  ;;  %p1552_p10 = scmp.lt.u32.totalorder %s1972_s14, %s2064_s8 }
 0x8a1   : > { %p1553_p6 = scmp.lt.u32.totalorder %s1551_s10, %s1547_s13  ;;  %p1555_p3 = scmp.lt.u32.totalorder %s1547_s13, %s1972_s14 }
 0x8a2   : > { %p1549_p2 = pnand %p1548_p12, %p2089_p7 }
 0x8a3   : > { %p1554_p13 = por %p1553_p6, %p1552_p10 }
 0x8a4   : > { %p1550_p4 = pneg %p1549_p2 }
 0x8a5   : > { %p1556_p5 = por %p1555_p3, %p1554_p13 }
 0x8a7   : > { %p1557_p8 = pnand %p1556_p5, %p1550_p4 }
 0x8a9   : > { %1560 = shalt.err (!%p1557_p8)
}
 0x8aa   : > { %s1648_s20 = smov 128   ;;  %s1649_s16 = smov 8   ;;  %v1236_v30 = vld [vmem:[%s2061_s5] ss:$0 sm:$0xff] }
 0x8ab   : > { %1377 = dma.vmem_to_hbm [thread:$0]  (%p2089_p7), %s1974_s24, 256, %s1972_s14, %s1041_s21, %s1648_s20, %s1648_s20, %s1649_s16  }
 0x8ac   : > { %v1237_v32 = vld [vmem:[%s2062_s6] ss:$0 sm:$0xff]  ;;  %s1240_s23 = sshll.u32 %s1717_s9, 7  ;;  %s376_s10 = scalar_lea.vmem [#allocation7], %s1847_s12 }
 0x8ad   : > { %s1054_s19 = sshll.u32 %s376_s10, 4  ;;  %s2011_s21 = scalar_lea.hbm %s2063_s7, %s1240_s23  ;;  %s2013_s19 = int_to_ptr.vmem [resolvable:$true] %s1054_s19 }
 0x8ae   : > { %s1036_s22 = scalar_lea.sflag [#allocation4], %s1844_s26  ;;  %s1561_s20 = scalar_lea.vmem %s2013_s19, 128 }
 0x8af   : > { %p1562_p9 = scmp.ne.s32.totalorder %s2013_s19, %s1561_s20  ;;  %s1650_s9 = smov [#allocation7]  }
 0x8b0   : > { %s1565_s12 = sshll.u32 %s1650_s9, 4  ;;  %s1566_s12 = int_to_ptr.vmem [resolvable:$false] %s1565_s12 }
 0x8b1   : > { %p1563_p0 = pnand %p1562_p9, %p2089_p7  ;;  %s1567_s16 = scalar_lea.vmem %s1566_s12, 256 }
 0x8b2   : > { %p1568_p11 = scmp.lt.s32.totalorder %s2013_s19, %s1566_s12  ;;  %p1569_p12 = scmp.lt.s32.totalorder %s1567_s16, %s1561_s20 }
 0x8b3   : > { %p1564_p1 = pneg %p1563_p0 }
 0x8b4   : > { %p1570_p2 = por %p1569_p12, %p1568_p11 }
 0x8b6   : > { %p1571_p4 = pnand %p1570_p2, %p1564_p1 }
 0x92a   : > { %v1013_v11 = vpop.xlane.xlu1 %1012 }
 0x92b   : > { %v1014_v27 = vmul.f32 0.03125, %v1013_v11 }
 0x92d   : > { %v1015_v28 = vadd.f32 1e-05, %v1014_v27 }
 0x92f   : > { %1471 = vrsqrt.f32 %v1015_v28 }
 0x939   : > { %v1472_v29 = vpop.eup %1471 }
 0x93a   : > { %v1017_v31 = vmul.f32 %v1472_v29, %v1009_v24 }
 0x93c   : > { %v1025_v33 = vmul.f32 %v1236_v30, %v1017_v31 }
 0x93e   : > { %v1033_v34 = vadd.f32 %v1237_v32, %v1025_v33 }
 0x940   : > { %1034 = vst.msk [vmem:[%s376_s10] sm:$0xff] %vm396_vm0, %v1033_v34 }
 0x941   : > { %1574 = shalt.err (!%p1571_p4)
}
 0x942   : > { %s1575_s26 = scalar_lea.hbm %s2011_s21, 128  ;;  %s1579_s13 = scalar_lea.hbm %s2063_s7, 256 }
 0x943   : > { %p1576_p10 = scmp.ne.s32.totalorder %s2011_s21, %s1575_s26  ;;  %p1580_p3 = scmp.lt.u32.totalorder %s2011_s21, %s2063_s7 }
 0x944   : > { %p1581_p5 = scmp.lt.u32.totalorder %s1579_s13, %s1575_s26  ;;  %p1583_p9 = scmp.lt.u32.totalorder %s1575_s26, %s2011_s21 }
 0x945   : > { %p1577_p6 = pnand %p1576_p10, %p2089_p7 }
 0x946   : > { %p1582_p8 = por %p1581_p5, %p1580_p3 }
 0x947   : > { %p1578_p13 = pneg %p1577_p6 }
 0x948   : > { %p1584_p0 = por %p1583_p9, %p1582_p8 }
 0x94a   : > { %p1585_p1 = pnand %p1584_p0, %p1578_p13 }
 0x94c   : > { %1588 = shalt.err (!%p1585_p1)
}
 0x94d   : > { %1376 = dma.vmem_to_hbm [thread:$0]  (%p2089_p7), %s2013_s19, 128, %s2011_s21, %s1036_s22  }
 0x94e PF: > { %s1082_s10 = sand.u32 1, %s1623_s27   ;;  %p2090_p11 = scmp.ne.s32.totalorder %s2074_s18, 0 }
 0x94f   : > { %p2091_p12 = scmp.ge.s32.totalorder %s1635_s30, 2  ;;  %s1083_s24 = scalar_lea.sflag [#allocation4], %s1082_s10 }
 0x951   : > { %p1388_p2 = pnand %p2091_p12, %p2090_p11 }
 0x953   : > { %1614 = dma.done.wait (!%p1388_p2), %s1083_s24, 128  }
 0x954   : > { %1616 = vsyncadd (!%p1388_p2), %s1083_s24, 4294967168  ;;  %s1092_s14 = scalar_lea.sflag [#allocation9], %s1082_s10 }
 0x955   : > { %1618 = dma.done.wait (!%p1388_p2), %s1092_s14, 256  }
 0x956   : > { %1620 = vsyncadd (!%p1388_p2), %s1092_s14, 4294967040  ;;  %s2092_s17 = sld [smem:[#allocation14_spill]]  ;;  %p28_p7 = scmp.ge.s32.totalorder %s1721_s11, 4  }
 0x957   : > { %s2093_s27 = smov %s1627_s28  ;;  %s2094_s28 = smov %s1631_s29 }
 0x958   : > { %s2096_s30 = smov %s1721_s11  ;;  %30 = sbr.rel (!%p28_p7) target bundleno = 11 (0xb), region = 127 }
 0x95c   : > { %s2095_s29 = smov %s2092_s17 }
 0x95f   :  { %1097 = vsyncpa [#allocation3], 1 }
 0x960   :  { %1099 = vsyncpa [#allocation3 + $0x1], 1 }
 0x961   :  { %1100 = vsyncpa [#allocation6], 1 }
 0x962   :  { %1102 = vsyncpa [#allocation6 + $0x1], 1 }
 0x963   :  { %1103 = vsyncpa [#allocation4], 1 }
 0x964   :  { %1105 = vsyncpa [#allocation4 + $0x1], 1 }
 0x965   :  { %1106 = vsyncpa [#allocation9], 1 }
 0x966   :  { %1108 = vsyncpa [#allocation9 + $0x1], 1 }

</bundles_post_ra>
